<compile_context>
chip_gen: v7x
topology: tpu7x:2x2x1
jax: 0.10.0
libtpu: 0.0.40
codegen_flags: <defaults>
</compile_context>

<pallas_src>
import jax
import jax.numpy as jnp
from jax import lax
from jax.experimental import pallas as pl
from jax.experimental.pallas import tpu as pltpu

BN_EPS = 1e-5
LANE = 128


def _round_up(x, m):
    return ((x + m - 1) // m) * m


# --------------------------------------------------------------------------- #
# Kernel: dot -> +b1' -> relu -> dot -> +b2' -> +x -> relu
# (BatchNorm folded into weights/biases offline; Dropout is identity in eval.)
# --------------------------------------------------------------------------- #
def residual_block_kernel(x_ref, w1_ref, w2_ref, b_ref, o_ref):
    x = x_ref[...]                                   # (tm, d_pad) f32
    b1 = b_ref[0:1, :]                               # (1, d_pad) f32 (BN-fused bias 1)
    b2 = b_ref[1:2, :]                               # (1, d_pad) f32 (BN-fused bias 2)

    # Linear1 + BN1 (folded): bf16 x bf16 matmul, f32 accumulate, f32 bias/relu.
    h = jnp.dot(x.astype(jnp.bfloat16), w1_ref[...],
                preferred_element_type=jnp.float32) + b1
    h = jnp.maximum(h, 0.0)

    # Dropout(p): identity in eval mode.

    # Linear2 + BN2 (folded).
    h = jnp.dot(h.astype(jnp.bfloat16), w2_ref[...],
                preferred_element_type=jnp.float32) + b2

    # Skip connection + final ReLU.
    o_ref[...] = jnp.maximum(h + x, 0.0).astype(o_ref.dtype)


# --------------------------------------------------------------------------- #
# One-time parameter fusion (call once, reuse across residual_block calls)
# --------------------------------------------------------------------------- #
def fuse_params(params, *, weight_dtype=jnp.bfloat16):
    """Fold eval-mode BatchNorm into the Linears, transpose, pad to a lane-dense
    (multiple-of-128) feature dim, cast weights to bf16. Off the per-call path."""
    d = params["w1"].shape[0]
    d_pad = _round_up(d, LANE)

    def fold(w, b, gamma, beta, mean, var):
        scale = gamma * lax.rsqrt(var + BN_EPS)            # (d,)
        w_t = w.T.astype(jnp.float32) * scale[None, :]     # x @ W^T, per-out-col scale
        b_f = scale * (b - mean) + beta
        return w_t, b_f

    w1t, b1 = fold(params["w1"], params["b1"], params["gamma1"],
                   params["beta1"], params["mean1"], params["var1"])
    w2t, b2 = fold(params["w2"], params["b2"], params["gamma2"],
                   params["beta2"], params["mean2"], params["var2"])

    def pad_mat(w):
        return (jnp.zeros((d_pad, d_pad), jnp.float32)
                .at[:d, :d].set(w).astype(weight_dtype))

    b_packed = (jnp.zeros((2, d_pad), jnp.float32)
                .at[0, :d].set(b1.astype(jnp.float32))
                .at[1, :d].set(b2.astype(jnp.float32)))

    return {"w1": pad_mat(w1t), "w2": pad_mat(w2t), "b": b_packed,
            "d": d, "d_pad": d_pad}


# --------------------------------------------------------------------------- #
# VMEM budget / tile selection
# --------------------------------------------------------------------------- #
def _vmem_budget_bytes():
    """~80% of physical VMEM: ~51 MiB on v7x (64 MiB), ~102 MiB on v5e/v6e."""
    phys = 64 * 1024 * 1024  # conservative default (v7x per-TC VMEM)
    try:
        info = pltpu.get_tpu_info()
        cap = getattr(info, "vmem_capacity_bytes", None)
        if cap:
            phys = int(cap)
    except Exception:
        pass
    return int(phys * 0.8)


def _pick_tm(N, d_pad, budget):
    weight_bytes = 2 * 2 * d_pad * d_pad            # two bf16 mats, single-buffered
    bias_bytes = 2 * d_pad * 4

    def fits(tm):
        io_bytes = 2 * (2 * tm * d_pad * 4)          # x + out f32 tiles, double-buffered
        return weight_bytes + bias_bytes + io_bytes <= budget

    tm_cap = 1024 if budget >= 90 * 1024 * 1024 else 512
    tm = min(tm_cap, _round_up(N, LANE))
    while tm > LANE and not fits(tm):
        tm = _round_up(tm // 2, LANE)
    # >=2 row tiles whenever possible so the parallel grid axis can shard
    # across both TensorCores on v7x (no cost on single-TC v5e/v6e).
    if N > LANE:
        tm = min(tm, _round_up(pl.cdiv(N, 2), LANE))
    return max(tm, LANE)


# --------------------------------------------------------------------------- #
# Wrapper
# --------------------------------------------------------------------------- #
def residual_block(x, fused, *, tm=None, out_dtype=None):
    """x: (N, d) float32. fused: output of fuse_params()."""
    N, d = x.shape
    assert d == fused["d"]
    d_pad = fused["d_pad"]
    out_dtype = jnp.float32 if out_dtype is None else out_dtype

    budget = _vmem_budget_bytes()
    if tm is None:
        tm = _pick_tm(N, d_pad, budget)
    N_pad = _round_up(N, tm)

    # Only build a padded copy when actually needed (avoids an extra HBM pass).
    padded = (N_pad != N) or (d_pad != d)
    if padded:
        x_in = (jnp.zeros((N_pad, d_pad), jnp.float32)
                .at[:N, :d].set(x.astype(jnp.float32)))
    else:
        x_in = x.astype(jnp.float32)

    cost = pl.CostEstimate(
        flops=4 * N_pad * d_pad * d_pad,
        transcendentals=0,
        bytes_accessed=(N_pad * d_pad * 4
                        + N_pad * d_pad * jnp.dtype(out_dtype).itemsize
                        + 2 * 2 * d_pad * d_pad
                        + 2 * d_pad * 4),
    )

    def build(single_buffer_weights):
        wkw = ({"pipeline_mode": pl.Buffered(1)} if single_buffer_weights else {})
        return pl.pallas_call(
            residual_block_kernel,
            out_shape=jax.ShapeDtypeStruct((N_pad, d_pad), out_dtype),
            grid_spec=pltpu.PrefetchScalarGridSpec(
                num_scalar_prefetch=0,
                grid=(N_pad // tm,),
                in_specs=[
                    pl.BlockSpec((tm, d_pad), lambda i: (i, 0)),            # x tile
                    pl.BlockSpec((d_pad, d_pad), lambda i: (0, 0), **wkw),  # W1' bf16
                    pl.BlockSpec((d_pad, d_pad), lambda i: (0, 0), **wkw),  # W2' bf16
                    pl.BlockSpec((2, d_pad), lambda i: (0, 0), **wkw),      # biases
                ],
                out_specs=pl.BlockSpec((tm, d_pad), lambda i: (i, 0)),
            ),
            compiler_params=pltpu.CompilerParams(
                dimension_semantics=("parallel",),
                vmem_limit_bytes=budget,
            ),
            cost_estimate=cost,
        )

    args = (x_in, fused["w1"], fused["w2"], fused["b"])
    try:
        out = build(True)(*args)
    except Exception:
        # Fallback: default double-buffered weight blocks (always supported).
        out = build(False)(*args)

    if padded:
        out = out[:N, :d]
    return out


# --------------------------------------------------------------------------- #
# Reference + test harness
# --------------------------------------------------------------------------- #
def make_params(key, d):
    ks = jax.random.split(key, 8)
    return {
        "w1": jax.random.normal(ks[0], (d, d), jnp.float32) * 0.1,   # PyTorch (out, in)
        "b1": jax.random.normal(ks[1], (d,), jnp.float32) * 0.1,
        "gamma1": 1.0 + 0.05 * jax.random.normal(ks[2], (d,), jnp.float32),
        "beta1": 0.05 * jax.random.normal(ks[3], (d,), jnp.float32),
        "mean1": 0.1 * jax.random.normal(ks[4], (d,), jnp.float32),
        "var1": 1.0 + 0.1 * jax.random.uniform(ks[5], (d,), jnp.float32),
        "w2": jax.random.normal(ks[6], (d, d), jnp.float32) * 0.1,
        "b2": jax.random.normal(ks[7], (d,), jnp.float32) * 0.1,
        "gamma2": 1.0 + 0.05 * jax.random.normal(ks[2], (d,), jnp.float32)[::-1],
        "beta2": 0.05 * jax.random.normal(ks[3], (d,), jnp.float32)[::-1],
        "mean2": 0.1 * jax.random.normal(ks[4], (d,), jnp.float32)[::-1],
        "var2": 1.0 + 0.1 * jax.random.uniform(ks[5], (d,), jnp.float32)[::-1],
    }


def residual_block_ref(x, p):
    """Pure-JAX f32 reference of the eval-mode forward pass."""
    h = x @ p["w1"].T + p["b1"]
    h = p["gamma1"] * (h - p["mean1"]) / jnp.sqrt(p["var1"] + BN_EPS) + p["beta1"]
    h = jnp.maximum(h, 0.0)
    h = h @ p["w2"].T + p["b2"]
    h = p["gamma2"] * (h - p["mean2"]) / jnp.sqrt(p["var2"] + BN_EPS) + p["beta2"]
    return jnp.maximum(h + x, 0.0)


def _check(out, ref, name):
    # bf16 matmul inputs with f32 accumulation -> relaxed, scale-aware tolerance.
    err = float(jnp.max(jnp.abs(out - ref) / (1.0 + jnp.abs(ref))))
    assert err < 5e-2, f"{name}: mismatch vs reference, max rel err {err}"


if __name__ == "__main__":
    key = jax.random.PRNGKey(0)

    # Case 1: small, unaligned shapes (features padded to 128 lanes).
    N, d = 16, 32
    kx, kp = jax.random.split(key)
    x = jax.random.normal(kx, (N, d), jnp.float32)
    params = make_params(kp, d)
    fused = fuse_params(params)
    out = jax.block_until_ready(residual_block(x, fused))
    assert out.shape == (N, d)
    _check(out, residual_block_ref(x, params), "case1")

    # Case 2: already (128, 128)-aligned shapes -> no wrapper pad/slice copies,
    # multi-tile parallel grid exercised.
    N2, d2 = 256, 128
    kx2, kp2 = jax.random.split(kp)
    x2 = jax.random.normal(kx2, (N2, d2), jnp.float32)
    params2 = make_params(kp2, d2)
    fused2 = fuse_params(params2)
    out2 = jax.block_until_ready(residual_block(x2, fused2))
    assert out2.shape == (N2, d2)
    _check(out2, residual_block_ref(x2, params2), "case2")

    print("KERNEL_OK")
</pallas_src>

<mosaic_0001>
module attributes {stable_mosaic.version = 11 : i64} {
  func.func @residual_block_kernel(%arg0: i32, %arg1: memref<128x128xf32, #tpu.memory_space<vmem>>, %arg2: memref<128x128xbf16, #tpu.memory_space<vmem>>, %arg3: memref<128x128xbf16, #tpu.memory_space<vmem>>, %arg4: memref<2x128xf32, #tpu.memory_space<vmem>>, %arg5: memref<128x128xf32, #tpu.memory_space<vmem>>) attributes {dimension_semantics = [#tpu.dimension_semantics<parallel>], iteration_bounds = array<i64: 1>, scalar_prefetch = 0 : i64, scratch_operands = 0 : i64, tpu.core_type = #tpu.core_type<tc>, window_params = [{transform_indices = @transform_0, window_bounds = array<i64: 128, 128>}, {pipeline_mode = #tpu.pipeline_mode<synchronous>, transform_indices = @transform_1, window_bounds = array<i64: 128, 128>}, {pipeline_mode = #tpu.pipeline_mode<synchronous>, transform_indices = @transform_2, window_bounds = array<i64: 128, 128>}, {pipeline_mode = #tpu.pipeline_mode<synchronous>, transform_indices = @transform_3, window_bounds = array<i64: 2, 128>}, {transform_indices = @transform_4, window_bounds = array<i64: 128, 128>}]} {
    %c0 = arith.constant 0 : index
    %c0_0 = arith.constant 0 : index
    %0 = vector.load %arg1[%c0, %c0_0] : memref<128x128xf32, #tpu.memory_space<vmem>>, vector<128x128xf32>
    %c0_1 = arith.constant 0 : index
    %c0_2 = arith.constant 0 : index
    %1 = vector.load %arg4[%c0_1, %c0_2] : memref<2x128xf32, #tpu.memory_space<vmem>>, vector<1x128xf32>
    %c1 = arith.constant 1 : index
    %c0_3 = arith.constant 0 : index
    %2 = vector.load %arg4[%c1, %c0_3] : memref<2x128xf32, #tpu.memory_space<vmem>>, vector<1x128xf32>
    %3 = arith.truncf %0 : vector<128x128xf32> to vector<128x128xbf16>
    %c0_4 = arith.constant 0 : index
    %c0_5 = arith.constant 0 : index
    %4 = vector.load %arg2[%c0_4, %c0_5] : memref<128x128xbf16, #tpu.memory_space<vmem>>, vector<128x128xbf16>
    %cst = arith.constant dense<0.000000e+00> : vector<128x128xf32>
    %5 = tpu.matmul %3, %4, %cst {dimension_numbers = #tpu.dot_dimension_numbers<[1], [0], [0], [1], [0, 0, 1, 1], [], []>} : vector<128x128xbf16>, vector<128x128xbf16>, vector<128x128xf32> -> vector<128x128xf32>
    %6 = vector.broadcast %1 : vector<1x128xf32> to vector<128x128xf32>
    %7 = arith.addf %5, %6 : vector<128x128xf32>
    %cst_6 = arith.constant 0.000000e+00 : f32
    %8 = vector.broadcast %cst_6 : f32 to vector<128x128xf32>
    %9 = arith.maximumf %7, %8 : vector<128x128xf32>
    %10 = arith.truncf %9 : vector<128x128xf32> to vector<128x128xbf16>
    %c0_7 = arith.constant 0 : index
    %c0_8 = arith.constant 0 : index
    %11 = vector.load %arg3[%c0_7, %c0_8] : memref<128x128xbf16, #tpu.memory_space<vmem>>, vector<128x128xbf16>
    %cst_9 = arith.constant dense<0.000000e+00> : vector<128x128xf32>
    %12 = tpu.matmul %10, %11, %cst_9 {dimension_numbers = #tpu.dot_dimension_numbers<[1], [0], [0], [1], [0, 0, 1, 1], [], []>} : vector<128x128xbf16>, vector<128x128xbf16>, vector<128x128xf32> -> vector<128x128xf32>
    %13 = vector.broadcast %2 : vector<1x128xf32> to vector<128x128xf32>
    %14 = arith.addf %12, %13 : vector<128x128xf32>
    %15 = arith.addf %14, %0 : vector<128x128xf32>
    %cst_10 = arith.constant 0.000000e+00 : f32
    %16 = vector.broadcast %cst_10 : f32 to vector<128x128xf32>
    %17 = arith.maximumf %15, %16 : vector<128x128xf32>
    %c0_11 = arith.constant 0 : index
    %c0_12 = arith.constant 0 : index
    %18 = vector.load %arg5[%c0_11, %c0_12] : memref<128x128xf32, #tpu.memory_space<vmem>>, vector<128x128xf32>
    tpu.vector_store %arg5[%c0_11, %c0_12], %17 {strides = array<i32>} : memref<128x128xf32, #tpu.memory_space<vmem>>, vector<128x128xf32>,
    return
  }
  func.func @transform_0(%arg0: i32) -> (i32, i32) {
    %c0_i32 = arith.constant 0 : i32
    %c0_i32_0 = arith.constant 0 : i32
    return %arg0, %c0_i32 : i32, i32
  }
  func.func @transform_1(%arg0: i32) -> (i32, i32) {
    %c0_i32 = arith.constant 0 : i32
    %c0_i32_0 = arith.constant 0 : i32
    %c0_i32_1 = arith.constant 0 : i32
    return %c0_i32, %c0_i32_0 : i32, i32
  }
  func.func @transform_2(%arg0: i32) -> (i32, i32) {
    %c0_i32 = arith.constant 0 : i32
    %c0_i32_0 = arith.constant 0 : i32
    %c0_i32_1 = arith.constant 0 : i32
    return %c0_i32, %c0_i32_0 : i32, i32
  }
  func.func @transform_3(%arg0: i32) -> (i32, i32) {
    %c0_i32 = arith.constant 0 : i32
    %c0_i32_0 = arith.constant 0 : i32
    %c0_i32_1 = arith.constant 0 : i32
    return %c0_i32, %c0_i32_0 : i32, i32
  }
  func.func @transform_4(%arg0: i32) -> (i32, i32) {
    %c0_i32 = arith.constant 0 : i32
    %c0_i32_0 = arith.constant 0 : i32
    return %arg0, %c0_i32 : i32, i32
  }
}

module attributes {stable_mosaic.version = 11 : i64} {
  func.func @residual_block_kernel(%arg0: i32, %arg1: memref<128x128xf32, #tpu.memory_space<vmem>>, %arg2: memref<128x128xbf16, #tpu.memory_space<vmem>>, %arg3: memref<128x128xbf16, #tpu.memory_space<vmem>>, %arg4: memref<2x128xf32, #tpu.memory_space<vmem>>, %arg5: memref<128x128xf32, #tpu.memory_space<vmem>>) attributes {dimension_semantics = [#tpu.dimension_semantics<parallel>], iteration_bounds = array<i64: 1>, scalar_prefetch = 0 : i64, scratch_operands = 0 : i64, tpu.core_type = #tpu.core_type<tc>, window_params = [{transform_indices = @transform_0, window_bounds = array<i64: 128, 128>}, {pipeline_mode = #tpu.pipeline_mode<synchronous>, transform_indices = @transform_1, window_bounds = array<i64: 128, 128>}, {pipeline_mode = #tpu.pipeline_mode<synchronous>, transform_indices = @transform_2, window_bounds = array<i64: 128, 128>}, {pipeline_mode = #tpu.pipeline_mode<synchronous>, transform_indices = @transform_3, window_bounds = array<i64: 2, 128>}, {transform_indices = @transform_4, window_bounds = array<i64: 128, 128>}]} {
    %c0 = arith.constant 0 : index
    %c0_0 = arith.constant 0 : index
    %0 = vector.load %arg1[%c0, %c0_0] : memref<128x128xf32, #tpu.memory_space<vmem>>, vector<128x128xf32>
    %c0_1 = arith.constant 0 : index
    %c0_2 = arith.constant 0 : index
    %1 = vector.load %arg4[%c0_1, %c0_2] : memref<2x128xf32, #tpu.memory_space<vmem>>, vector<1x128xf32>
    %c1 = arith.constant 1 : index
    %c0_3 = arith.constant 0 : index
    %2 = vector.load %arg4[%c1, %c0_3] : memref<2x128xf32, #tpu.memory_space<vmem>>, vector<1x128xf32>
    %3 = arith.truncf %0 : vector<128x128xf32> to vector<128x128xbf16>
    %c0_4 = arith.constant 0 : index
    %c0_5 = arith.constant 0 : index
    %4 = vector.load %arg2[%c0_4, %c0_5] : memref<128x128xbf16, #tpu.memory_space<vmem>>, vector<128x128xbf16>
    %cst = arith.constant dense<0.000000e+00> : vector<128x128xf32>
    %5 = tpu.matmul %3, %4, %cst {dimension_numbers = #tpu.dot_dimension_numbers<[1], [0], [0], [1], [0, 0, 1, 1], [], []>} : vector<128x128xbf16>, vector<128x128xbf16>, vector<128x128xf32> -> vector<128x128xf32>
    %6 = vector.broadcast %1 : vector<1x128xf32> to vector<128x128xf32>
    %7 = arith.addf %5, %6 : vector<128x128xf32>
    %cst_6 = arith.constant 0.000000e+00 : f32
    %8 = vector.broadcast %cst_6 : f32 to vector<128x128xf32>
    %9 = arith.maximumf %7, %8 : vector<128x128xf32>
    %10 = arith.truncf %9 : vector<128x128xf32> to vector<128x128xbf16>
    %c0_7 = arith.constant 0 : index
    %c0_8 = arith.constant 0 : index
    %11 = vector.load %arg3[%c0_7, %c0_8] : memref<128x128xbf16, #tpu.memory_space<vmem>>, vector<128x128xbf16>
    %cst_9 = arith.constant dense<0.000000e+00> : vector<128x128xf32>
    %12 = tpu.matmul %10, %11, %cst_9 {dimension_numbers = #tpu.dot_dimension_numbers<[1], [0], [0], [1], [0, 0, 1, 1], [], []>} : vector<128x128xbf16>, vector<128x128xbf16>, vector<128x128xf32> -> vector<128x128xf32>
    %13 = vector.broadcast %2 : vector<1x128xf32> to vector<128x128xf32>
    %14 = arith.addf %12, %13 : vector<128x128xf32>
    %15 = arith.addf %14, %0 : vector<128x128xf32>
    %cst_10 = arith.constant 0.000000e+00 : f32
    %16 = vector.broadcast %cst_10 : f32 to vector<128x128xf32>
    %17 = arith.maximumf %15, %16 : vector<128x128xf32>
    %c0_11 = arith.constant 0 : index
    %c0_12 = arith.constant 0 : index
    %18 = vector.load %arg5[%c0_11, %c0_12] : memref<128x128xf32, #tpu.memory_space<vmem>>, vector<128x128xf32>
    tpu.vector_store %arg5[%c0_11, %c0_12], %17 {strides = array<i32>} : memref<128x128xf32, #tpu.memory_space<vmem>>, vector<128x128xf32>,
    return
  }
  func.func @transform_0(%arg0: i32) -> (i32, i32) {
    %c0_i32 = arith.constant 0 : i32
    %c0_i32_0 = arith.constant 0 : i32
    return %arg0, %c0_i32 : i32, i32
  }
  func.func @transform_1(%arg0: i32) -> (i32, i32) {
    %c0_i32 = arith.constant 0 : i32
    %c0_i32_0 = arith.constant 0 : i32
    %c0_i32_1 = arith.constant 0 : i32
    return %c0_i32, %c0_i32_0 : i32, i32
  }
  func.func @transform_2(%arg0: i32) -> (i32, i32) {
    %c0_i32 = arith.constant 0 : i32
    %c0_i32_0 = arith.constant 0 : i32
    %c0_i32_1 = arith.constant 0 : i32
    return %c0_i32, %c0_i32_0 : i32, i32
  }
  func.func @transform_3(%arg0: i32) -> (i32, i32) {
    %c0_i32 = arith.constant 0 : i32
    %c0_i32_0 = arith.constant 0 : i32
    %c0_i32_1 = arith.constant 0 : i32
    return %c0_i32, %c0_i32_0 : i32, i32
  }
  func.func @transform_4(%arg0: i32) -> (i32, i32) {
    %c0_i32 = arith.constant 0 : i32
    %c0_i32_0 = arith.constant 0 : i32
    return %arg0, %c0_i32 : i32, i32
  }
}

</mosaic_0001>

<bundles_post_ra>
// kernel: tpu_custom_call.1
= control target key start
LH: loop header
LB: loop body
LE: loop exit
PB: predicated region body
PF: predicated region fallthrough
CT: control target
= control target key end

     0   :  { %9 = vsyncpa [#allocation3], 0  ;;  %s919_s0 = inlined_call_operand.hbm [shape: f32[128,128], index: 0, kind: input, shape index: {}]   ;;  %s920_s1 = inlined_call_operand.hbm [shape: bf16[128,128], index: 1, kind: input, shape index: {}]   ;;  %s921_s2 = inlined_call_operand.hbm [shape: bf16[128,128], index: 2, kind: input, shape index: {}]   ;;  %s922_s3 = inlined_call_operand.vmem [shape: f32[2,128], index: 3, kind: input, shape index: {}]   ;;  %s923_s4 = inlined_call_operand.hbm [shape: f32[128,128], index: 4, kind: output, shape index: {}]  }
   0x1   :  { %10 = vsyncpa [#allocation6], 0 }
   0x2   :  { %11 = vsyncpa [#allocation4], 0  ;;  %s738_s15 = smov [#allocation5]   ;;  %s644_s19 = scalar_lea.hbm %s920_s1, 1024 }
   0x3   :  { %s29_s16 = sshll.u32 %s738_s15, 4  ;;  %p645_p0 = scmp.ne.s32.totalorder %s920_s1, %s644_s19  ;;  %s30_s16 = int_to_ptr.vmem [resolvable:$true] %s29_s16 }
   0x4   :  { %p648_p1 = scmp.lt.u32.totalorder %s644_s19, %s920_s1 }
   0x6   :  { %p650_p2 = pnand %p648_p1, %p645_p0 }
   0x8   :  { %653 = shalt.err (!%p650_p2)
}
   0x9   :  { %s654_s24 = scalar_lea.vmem %s30_s16, 1024  ;;  %p659_p4 = scmp.lt.s32.totalorder %s30_s16, %s30_s16 }
   0xa   :  { %p655_p3 = scmp.ne.s32.totalorder %s30_s16, %s654_s24  ;;  %p660_p5 = scmp.lt.s32.totalorder %s654_s24, %s654_s24 }
   0xc   :  { %p661_p6 = por %p660_p5, %p659_p4 }
   0xe   :  { %p662_p7 = pnand %p661_p6, %p655_p3 }
  0x10   :  { %665 = shalt.err (!%p662_p7)
}
  0x11   :  { %s739_s25 = smov 64   ;;  %s740_s26 = smov 4  }
  0x12   :  { %35 = dma.hbm_to_vmem [thread:$0]  %s920_s1, 1024, %s30_s16, [#allocation6], %s739_s25, %s739_s25, %s740_s26  }
  0x13   :  { %s741_s29 = smov [#allocation2]   ;;  %s666_s7 = scalar_lea.hbm %s919_s0, 2048 }
  0x14   :  { %s17_s30 = sshll.u32 %s741_s29, 4  ;;  %p667_p8 = scmp.ne.s32.totalorder %s919_s0, %s666_s7  ;;  %s18_s30 = int_to_ptr.vmem [resolvable:$true] %s17_s30 }
  0x15   :  { %p670_p9 = scmp.lt.u32.totalorder %s666_s7, %s919_s0 }
  0x17   :  { %p672_p10 = pnand %p670_p9, %p667_p8 }
  0x19   :  { %675 = shalt.err (!%p672_p10)
}
  0x1a   :  { %s676_s12 = scalar_lea.vmem %s18_s30, 2048  ;;  %p681_p12 = scmp.lt.s32.totalorder %s18_s30, %s18_s30 }
  0x1b   :  { %p677_p11 = scmp.ne.s32.totalorder %s18_s30, %s676_s12  ;;  %p682_p13 = scmp.lt.s32.totalorder %s676_s12, %s676_s12 }
  0x1d   :  { %p683_p0 = por %p682_p13, %p681_p12 }
  0x1f   :  { %p684_p1 = pnand %p683_p0, %p677_p11 }
  0x21   :  { %687 = shalt.err (!%p684_p1)
}
  0x22   :  { %s742_s1 = smov 128   ;;  %s743_s13 = smov 8  }
  0x23   :  { %23 = dma.hbm_to_vmem [thread:$0]  %s919_s0, 2048, %s18_s30, [#allocation3], %s742_s1, %s742_s1, %s743_s13  }
  0x24   :  { %s744_s16 = smov [#allocation7]   ;;  %s688_s20 = scalar_lea.hbm %s921_s2, 1024 }
  0x25   :  { %s41_s17 = sshll.u32 %s744_s16, 4  ;;  %p689_p2 = scmp.ne.s32.totalorder %s921_s2, %s688_s20  ;;  %s42_s17 = int_to_ptr.vmem [resolvable:$true] %s41_s17 }
  0x26   :  { %p692_p3 = scmp.lt.u32.totalorder %s688_s20, %s921_s2 }
  0x28   :  { %p694_p4 = pnand %p692_p3, %p689_p2 }
  0x2a   :  { %697 = shalt.err (!%p694_p4)
}
  0x2b   :  { %s698_s27 = scalar_lea.vmem %s42_s17, 1024  ;;  %p703_p6 = scmp.lt.s32.totalorder %s42_s17, %s42_s17 }
  0x2c   :  { %p699_p5 = scmp.ne.s32.totalorder %s42_s17, %s698_s27  ;;  %p704_p7 = scmp.lt.s32.totalorder %s698_s27, %s698_s27 }
  0x2e   :  { %p705_p8 = por %p704_p7, %p703_p6 }
  0x30   :  { %p706_p9 = pnand %p705_p8, %p699_p5 }
  0x32   :  { %709 = shalt.err (!%p706_p9)
}
  0x33   :  { %47 = dma.hbm_to_vmem [thread:$0]  %s921_s2, 1024, %s42_s17, [#allocation6], %s739_s25, %s739_s25, %s740_s26  }
  0x34   :  { %732 = dma.done.wait [#allocation3], 2048  }
  0x35   :  { %733 = vsyncadd [#allocation3], 4294965248 }
  0x36   :  { %734 = dma.done.wait [#allocation6], 2048  }
  0x37   :  { %735 = vsyncadd [#allocation6], 4294965248  ;;  %v628_v0 = vld [vmem:[#allocation5] sm:$0xff]   ;;  %v629_v1 = vld [vmem:[#allocation5 + $0x8] sm:$0xff]  }
  0x38   :  { %556 = vmatprep.subr.bf16.mxu0 %v628_v0  ;;  %v630_v2 = vld [vmem:[#allocation5 + $0x10] sm:$0xff]   ;;  %v631_v3 = vld [vmem:[#allocation5 + $0x18] sm:$0xff]   ;;  %v816_v4 = vld [vmem:[#allocation2] sm:$0xff] }
  0x39   :  { %557 = vmatpush3.bf16.msra.mxu0 %v628_v0  ;;  %v818_v5 = vld [vmem:[#allocation2 + $0x8] sm:$0xff]  ;;  %v632_v7 = vld [vmem:[#allocation5 + $0x20] sm:$0xff]   ;;  %v638_v11 = vld [vmem:[#allocation7 + $0x10] sm:$0xff]  }
  0x3a   :  { %558 = vmatprep.subr.bf16.mxu0 %v629_v1  ;;  %v78_v6 = vpack.c.bf16 %v818_v5, %v816_v4  ;;  %v636_v8 = vld [vmem:[#allocation7] sm:$0xff]   ;;  %v637_v9 = vld [vmem:[#allocation7 + $0x8] sm:$0xff]   ;;  %v634_v12 = vld [vmem:[#allocation5 + $0x30] sm:$0xff]  }
  0x3b   :  { %v633_v10 = vld [vmem:[#allocation5 + $0x28] sm:$0xff]   ;;  %588 = vmatprep.subr.bf16.mxu1 %v636_v8  ;;  %v639_v13 = vld [vmem:[#allocation7 + $0x18] sm:$0xff]   ;;  %v640_v15 = vld [vmem:[#allocation7 + $0x20] sm:$0xff]  }
  0x3c   :  { %572 = vmatprep.mubr.bf16.mxu0 %v78_v6  ;;  %589 = vmatpush3.bf16.msra.mxu1 %v636_v8  ;;  %v635_v14 = vld [vmem:[#allocation5 + $0x38] sm:$0xff]   ;;  %v822_v16 = vld [vmem:[#allocation2 + $0x10] sm:$0xff]  ;;  %v826_v18 = vld [vmem:[#allocation2 + $0x20] sm:$0xff] }
  0x3d   :  { %559 = vmatpush3.bf16.msra.mxu0 %v629_v1  ;;  %590 = vmatprep.subr.bf16.mxu1 %v637_v9  ;;  %v824_v17 = vld [vmem:[#allocation2 + $0x18] sm:$0xff]  ;;  %v828_v19 = vld [vmem:[#allocation2 + $0x28] sm:$0xff]  ;;  %v834_v23 = vld [vmem:[#allocation2 + $0x30] sm:$0xff] }
  0x3e   :  { %560 = vmatprep.subr.bf16.mxu0 %v630_v2  ;;  %v79_v20 = vpack.c.bf16 %v824_v17, %v822_v16  ;;  %v641_v21 = vld [vmem:[#allocation7 + $0x28] sm:$0xff]   ;;  %v80_v22 = vpack.c.bf16 %v828_v19, %v826_v18  ;;  %v836_v24 = vld [vmem:[#allocation2 + $0x38] sm:$0xff]  ;;  %v838_v25 = vld [vmem:[#allocation2 + $0x40] sm:$0xff] }
  0x3f   :  { %v840_v26 = vld [vmem:[#allocation2 + $0x48] sm:$0xff]  ;;  %v81_v27 = vpack.c.bf16 %v836_v24, %v834_v23  ;;  %v846_v29 = vld [vmem:[#allocation2 + $0x50] sm:$0xff]  ;;  %v848_v30 = vld [vmem:[#allocation2 + $0x58] sm:$0xff] }
  0x40   :  { %591 = vmatpush3.bf16.msra.mxu1 %v637_v9  ;;  %v82_v28 = vpack.c.bf16 %v840_v26, %v838_v25  ;;  %v850_v31 = vld [vmem:[#allocation2 + $0x60] sm:$0xff]  ;;  %v852_v32 = vld [vmem:[#allocation2 + $0x68] sm:$0xff]  ;;  %v83_v33 = vpack.c.bf16 %v848_v30, %v846_v29  ;;  %v858_v35 = vld [vmem:[#allocation2 + $0x70] sm:$0xff] }
  0x41   :  { %561 = vmatpush3.bf16.msra.mxu0 %v630_v2  ;;  %592 = vmatprep.subr.bf16.mxu1 %v638_v11  ;;  %v84_v34 = vpack.c.bf16 %v852_v32, %v850_v31  ;;  %v860_v36 = vld [vmem:[#allocation2 + $0x78] sm:$0xff]  ;;  %v642_v38 = vld [vmem:[#allocation7 + $0x30] sm:$0xff]   ;;  %v506_v40 = vld [vmem:[%s922_s3] ss:$0 sm:$0xff] }
  0x42   :  { %562 = vmatprep.subr.bf16.mxu0 %v631_v3  ;;  %v85_v37 = vpack.c.bf16 %v860_v36, %v858_v35  ;;  %v643_v39 = vld [vmem:[#allocation7 + $0x38] sm:$0xff]  }
  0x44   :  { %593 = vmatpush3.bf16.msra.mxu1 %v638_v11 }
  0x45   :  { %563 = vmatpush3.bf16.msra.mxu0 %v631_v3  ;;  %594 = vmatprep.subr.bf16.mxu1 %v639_v13 }
  0x46   :  { %564 = vmatprep.subr.bf16.mxu0 %v632_v7 }
  0x48   :  { %595 = vmatpush3.bf16.msra.mxu1 %v639_v13 }
  0x49   :  { %565 = vmatpush3.bf16.msra.mxu0 %v632_v7  ;;  %596 = vmatprep.subr.bf16.mxu1 %v640_v15 }
  0x4a   :  { %566 = vmatprep.subr.bf16.mxu0 %v633_v10 }
  0x4c   :  { %597 = vmatpush3.bf16.msra.mxu1 %v640_v15 }
  0x4d   :  { %567 = vmatpush3.bf16.msra.mxu0 %v633_v10  ;;  %598 = vmatprep.subr.bf16.mxu1 %v641_v21 }
  0x4e   :  { %568 = vmatprep.subr.bf16.mxu0 %v634_v12 }
  0x50   :  { %599 = vmatpush3.bf16.msra.mxu1 %v641_v21 }
  0x51   :  { %569 = vmatpush3.bf16.msra.mxu0 %v634_v12  ;;  %600 = vmatprep.subr.bf16.mxu1 %v642_v38 }
  0x52   :  { %570 = vmatprep.subr.bf16.mxu0 %v635_v14 }
  0x54   :  { %601 = vmatpush3.bf16.msra.mxu1 %v642_v38 }
  0x55   :  { %571 = vmatpush3.bf16.msra.mxu0 %v635_v14  ;;  %602 = vmatprep.subr.bf16.mxu1 %v643_v39 }
  0x58   :  { %573 = vmatmul.mubr.bf16.vlgmr.msra.gmra.mrb[0].mxu0 %v79_v20  ;;  %603 = vmatpush3.bf16.msra.mxu1 %v643_v39 }
  0x59   :  { %576 = vmatprep.mubr.bf16.mxu0 %v80_v22 }
  0x60   :  { %577 = vmatmul.mubr.bf16.gmra.mrb[4].mxu0 %v81_v27 }
  0x61   :  { %580 = vmatprep.mubr.bf16.mxu0 %v82_v28 }
  0x68   :  { %581 = vmatmul.mubr.bf16.gmra.mrb[8].mxu0 %v83_v33 }
  0x69   :  { %584 = vmatprep.mubr.bf16.mxu0 %v84_v34 }
  0x70   :  { %585 = vmatmul.mubr.bf16.gmra.mrb[12].mxu0 %v85_v37 }
 0x12b   :  { %v574_v41 = vpop.f32.mrb[0].mxu0 }
 0x12c   :  { %v197_v42 = vadd.f32 %v574_v41, %v506_v40  ;;  %v188_v43 = vpop.f32.mrb[1].mxu0 }
 0x12d   :  { %v189_v44 = vadd.f32 %v506_v40, %v188_v43  ;;  %v575_v45 = vpop.f32.mrb[2].mxu0 }
 0x12e   :  { %v200_v46 = vadd.f32 %v575_v45, %v506_v40  ;;  %v191_v47 = vpop.f32.mrb[3].mxu0  ;;  %v253_v49 = vmax.f32 %v197_v42, 0.0 }
 0x12f   :  { %v192_v48 = vadd.f32 %v506_v40, %v191_v47  ;;  %v251_v51 = vmax.f32 %v189_v44, 0.0 }
 0x130   :  { %v254_v50 = vmax.f32 %v200_v46, 0.0 }
 0x131   :  { %v252_v52 = vmax.f32 %v192_v48, 0.0 }
 0x132   :  { %v268_v53 = vpack.c.bf16 %v254_v50, %v253_v49  ;;  %v870_v50 = vld [vmem:[%s922_s3 + $0x1] ss:$0 sm:$0xff]  ;;  %s745_s3 = smov [#allocation8]  }
 0x133   :  { %v578_v54 = vpop.f32.mrb[4].mxu0  ;;  %v267_v55 = vpack.c.bf16 %v252_v52, %v251_v51  ;;  %s493_s30 = sshll.u32 %s745_s3, 4  ;;  %s494_s30 = int_to_ptr.vmem [resolvable:$true] %s493_s30 }
 0x134   :  { %v213_v56 = vadd.f32 %v578_v54, %v506_v40  ;;  %v204_v57 = vpop.f32.mrb[5].mxu0  ;;  %s710_s5 = scalar_lea.vmem %s494_s30, 2048  ;;  %p715_p11 = scmp.lt.s32.totalorder %s494_s30, %s494_s30 }
 0x135   :  { %v205_v58 = vadd.f32 %v506_v40, %v204_v57  ;;  %v579_v59 = vpop.f32.mrb[6].mxu0  ;;  %604 = vmatprep.mubr.bf16.mxu1 %v267_v55  ;;  %p711_p10 = scmp.ne.s32.totalorder %s494_s30, %s710_s5  ;;  %p716_p12 = scmp.lt.s32.totalorder %s710_s5, %s710_s5 }
 0x136   :  { %v216_v60 = vadd.f32 %v579_v59, %v506_v40  ;;  %v207_v61 = vpop.f32.mrb[7].mxu0  ;;  %605 = vmatmul.mubr.bf16.vlgmr.msra.gmra.mrb[0].mxu1 %v268_v53  ;;  %v257_v63 = vmax.f32 %v213_v56, 0.0 }
 0x137   :  { %v208_v62 = vadd.f32 %v506_v40, %v207_v61  ;;  %v255_v1 = vmax.f32 %v205_v58, 0.0  ;;  %p717_p13 = por %p716_p12, %p715_p11 }
 0x138   :  { %v258_v0 = vmax.f32 %v216_v60, 0.0 }
 0x139   :  { %v256_v2 = vmax.f32 %v208_v62, 0.0  ;;  %p718_p0 = pnand %p717_p13, %p711_p10 }
 0x13a   :  { %v270_v3 = vpack.c.bf16 %v258_v0, %v257_v63 }
 0x13b   :  { %v269_v6 = vpack.c.bf16 %v256_v2, %v255_v1  ;;  %v582_v7 = vpop.f32.mrb[8].mxu0 }
 0x13c   :  { %v229_v8 = vadd.f32 %v582_v7, %v506_v40  ;;  %v220_v9 = vpop.f32.mrb[9].mxu0 }
 0x13d   :  { %v221_v10 = vadd.f32 %v506_v40, %v220_v9  ;;  %v583_v11 = vpop.f32.mrb[10].mxu0  ;;  %608 = vmatprep.mubr.bf16.mxu1 %v269_v6 }
 0x13e   :  { %v232_v12 = vadd.f32 %v583_v11, %v506_v40  ;;  %v223_v13 = vpop.f32.mrb[11].mxu0  ;;  %609 = vmatmul.mubr.bf16.gmra.mrb[4].mxu1 %v270_v3  ;;  %v261_v15 = vmax.f32 %v229_v8, 0.0 }
 0x13f   :  { %v224_v14 = vadd.f32 %v506_v40, %v223_v13  ;;  %v259_v21 = vmax.f32 %v221_v10, 0.0 }
 0x140   :  { %v262_v20 = vmax.f32 %v232_v12, 0.0 }
 0x141   :  { %v260_v22 = vmax.f32 %v224_v14, 0.0 }
 0x142   :  { %v272_v27 = vpack.c.bf16 %v262_v20, %v261_v15 }
 0x143   :  { %v271_v28 = vpack.c.bf16 %v260_v22, %v259_v21  ;;  %v586_v33 = vpop.f32.mrb[12].mxu0 }
 0x144   :  { %v245_v34 = vadd.f32 %v586_v33, %v506_v40  ;;  %v236_v37 = vpop.f32.mrb[13].mxu0 }
 0x145   :  { %v237_v38 = vadd.f32 %v506_v40, %v236_v37  ;;  %v587_v39 = vpop.f32.mrb[14].mxu0  ;;  %612 = vmatprep.mubr.bf16.mxu1 %v271_v28 }
 0x146   :  { %v248_v41 = vadd.f32 %v587_v39, %v506_v40  ;;  %v239_v42 = vpop.f32.mrb[15].mxu0  ;;  %613 = vmatmul.mubr.bf16.gmra.mrb[8].mxu1 %v272_v27  ;;  %v265_v44 = vmax.f32 %v245_v34, 0.0 }
 0x147   :  { %v240_v43 = vadd.f32 %v506_v40, %v239_v42  ;;  %v263_v46 = vmax.f32 %v237_v38, 0.0 }
 0x148   :  { %v266_v45 = vmax.f32 %v248_v41, 0.0 }
 0x149   :  { %v264_v47 = vmax.f32 %v240_v43, 0.0 }
 0x14a   :  { %v274_v48 = vpack.c.bf16 %v266_v45, %v265_v44 }
 0x14b   :  { %v273_v49 = vpack.c.bf16 %v264_v47, %v263_v46 }
 0x14d   :  { %616 = vmatprep.mubr.bf16.mxu1 %v273_v49 }
 0x14e   :  { %617 = vmatmul.mubr.bf16.gmra.mrb[12].mxu1 %v274_v48 }
 0x209   :  { %v606_v51 = vpop.f32.mrb[0].mxu1 }
 0x20a   :  { %v386_v52 = vadd.f32 %v606_v51, %v870_v50  ;;  %v377_v53 = vpop.f32.mrb[1].mxu1 }
 0x20b   :  { %v378_v54 = vadd.f32 %v870_v50, %v377_v53  ;;  %v607_v40 = vpop.f32.mrb[2].mxu1 }
 0x20c   :  { %v442_v55 = vadd.f32 %v386_v52, %v822_v16  ;;  %v389_v56 = vadd.f32 %v607_v40, %v870_v50  ;;  %v380_v57 = vpop.f32.mrb[3].mxu1 }
 0x20d   :  { %v440_v58 = vadd.f32 %v378_v54, %v816_v4  ;;  %v381_v59 = vadd.f32 %v870_v50, %v380_v57 }
 0x20e   :  { %v458_v60 = vmax.f32 %v442_v55, 0.0  ;;  %v443_v61 = vadd.f32 %v389_v56, %v824_v17 }
 0x20f   :  { %v456_v62 = vmax.f32 %v440_v58, 0.0  ;;  %v441_v63 = vadd.f32 %v381_v59, %v818_v5 }
 0x210   :  { %474 = vst [vmem:[#allocation8 + $0x10] sm:$0xff] %v458_v60  ;;  %v459_v0 = vmax.f32 %v443_v61, 0.0 }
 0x211   :  { %472 = vst [vmem:[#allocation8] sm:$0xff] %v456_v62  ;;  %v457_v1 = vmax.f32 %v441_v63, 0.0  ;;  %v610_v2 = vpop.f32.mrb[4].mxu1 }
 0x212   :  { %475 = vst [vmem:[#allocation8 + $0x18] sm:$0xff] %v459_v0  ;;  %v402_v16 = vadd.f32 %v610_v2, %v870_v50  ;;  %v393_v3 = vpop.f32.mrb[5].mxu1 }
 0x213   :  { %473 = vst [vmem:[#allocation8 + $0x8] sm:$0xff] %v457_v1  ;;  %v394_v4 = vadd.f32 %v870_v50, %v393_v3  ;;  %v611_v6 = vpop.f32.mrb[6].mxu1 }
 0x214   :  { %v446_v7 = vadd.f32 %v402_v16, %v834_v23  ;;  %v405_v17 = vadd.f32 %v611_v6, %v870_v50  ;;  %v396_v8 = vpop.f32.mrb[7].mxu1 }
 0x215   :  { %v444_v5 = vadd.f32 %v394_v4, %v826_v18  ;;  %v397_v9 = vadd.f32 %v870_v50, %v396_v8 }
 0x216   :  { %v462_v10 = vmax.f32 %v446_v7, 0.0  ;;  %v447_v11 = vadd.f32 %v405_v17, %v836_v24 }
 0x217   :  { %v460_v12 = vmax.f32 %v444_v5, 0.0  ;;  %v445_v13 = vadd.f32 %v397_v9, %v828_v19 }
 0x218   :  { %478 = vst [vmem:[#allocation8 + $0x30] sm:$0xff] %v462_v10  ;;  %v463_v14 = vmax.f32 %v447_v11, 0.0 }
 0x219   :  { %476 = vst [vmem:[#allocation8 + $0x20] sm:$0xff] %v460_v12  ;;  %v461_v15 = vmax.f32 %v445_v13, 0.0  ;;  %v614_v20 = vpop.f32.mrb[8].mxu1 }
 0x21a   :  { %479 = vst [vmem:[#allocation8 + $0x38] sm:$0xff] %v463_v14  ;;  %v418_v23 = vadd.f32 %v614_v20, %v870_v50  ;;  %v409_v21 = vpop.f32.mrb[9].mxu1 }
 0x21b   :  { %477 = vst [vmem:[#allocation8 + $0x28] sm:$0xff] %v461_v15  ;;  %v410_v18 = vadd.f32 %v870_v50, %v409_v21  ;;  %v615_v22 = vpop.f32.mrb[10].mxu1 }
 0x21c   :  { %v450_v27 = vadd.f32 %v418_v23, %v846_v29  ;;  %v421_v24 = vadd.f32 %v615_v22, %v870_v50  ;;  %v412_v28 = vpop.f32.mrb[11].mxu1 }
 0x21d   :  { %v448_v19 = vadd.f32 %v410_v18, %v838_v25  ;;  %v413_v33 = vadd.f32 %v870_v50, %v412_v28 }
 0x21e   :  { %v466_v34 = vmax.f32 %v450_v27, 0.0  ;;  %v451_v37 = vadd.f32 %v421_v24, %v848_v30 }
 0x21f   :  { %v464_v38 = vmax.f32 %v448_v19, 0.0  ;;  %v449_v39 = vadd.f32 %v413_v33, %v840_v26 }
 0x220   :  { %482 = vst [vmem:[#allocation8 + $0x50] sm:$0xff] %v466_v34  ;;  %v467_v41 = vmax.f32 %v451_v37, 0.0 }
 0x221   :  { %480 = vst [vmem:[#allocation8 + $0x40] sm:$0xff] %v464_v38  ;;  %v465_v42 = vmax.f32 %v449_v39, 0.0  ;;  %v618_v43 = vpop.f32.mrb[12].mxu1 }
 0x222   :  { %483 = vst [vmem:[#allocation8 + $0x58] sm:$0xff] %v467_v41  ;;  %v434_v29 = vadd.f32 %v618_v43, %v870_v50  ;;  %v425_v44 = vpop.f32.mrb[13].mxu1 }
 0x223   :  { %481 = vst [vmem:[#allocation8 + $0x48] sm:$0xff] %v465_v42  ;;  %v426_v25 = vadd.f32 %v870_v50, %v425_v44  ;;  %v619_v45 = vpop.f32.mrb[14].mxu1 }
 0x224   :  { %v454_v46 = vadd.f32 %v434_v29, %v858_v35  ;;  %v437_v30 = vadd.f32 %v619_v45, %v870_v50  ;;  %v428_v47 = vpop.f32.mrb[15].mxu1 }
 0x225   :  { %v452_v26 = vadd.f32 %v426_v25, %v850_v31  ;;  %v429_v48 = vadd.f32 %v870_v50, %v428_v47 }
 0x226   :  { %v470_v49 = vmax.f32 %v454_v46, 0.0  ;;  %v455_v51 = vadd.f32 %v437_v30, %v860_v36 }
 0x227   :  { %v468_v52 = vmax.f32 %v452_v26, 0.0  ;;  %v453_v53 = vadd.f32 %v429_v48, %v852_v32 }
 0x228   :  { %486 = vst [vmem:[#allocation8 + $0x70] sm:$0xff] %v470_v49  ;;  %v471_v54 = vmax.f32 %v455_v51, 0.0 }
 0x229   :  { %484 = vst [vmem:[#allocation8 + $0x60] sm:$0xff] %v468_v52  ;;  %v469_v40 = vmax.f32 %v453_v53, 0.0 }
 0x22a   :  { %487 = vst [vmem:[#allocation8 + $0x78] sm:$0xff] %v471_v54 }
 0x22b   :  { %485 = vst [vmem:[#allocation8 + $0x68] sm:$0xff] %v469_v40 }
 0x22c   :  { %721 = shalt.err (!%p718_p0)
}
 0x22d   :  { %s722_s8 = scalar_lea.hbm %s923_s4, 2048 }
 0x22e   :  { %p723_p1 = scmp.ne.s32.totalorder %s923_s4, %s722_s8  ;;  %p726_p2 = scmp.lt.u32.totalorder %s722_s8, %s923_s4 }
 0x230   :  { %p728_p3 = pnand %p726_p2, %p723_p1 }
 0x232   :  { %731 = shalt.err (!%p728_p3)
}
 0x233   :  { %499 = dma.vmem_to_hbm [thread:$0]  %s494_s30, 2048, %s923_s4, [#allocation4], %s742_s1, %s742_s1, %s743_s13  }
 0x234   :  { %736 = dma.done.wait [#allocation4], 2048  }
 0x235   :  { %737 = vsyncadd [#allocation4], 4294965248 }
 0x236   :  { %503 = vsyncpa [#allocation3], 1 }
 0x237   :  { %504 = vsyncpa [#allocation6], 1 }
 0x238   :  { %505 = vsyncpa [#allocation4], 1 }

// kernel: tpu_custom_call.1
= control target key start
LH: loop header
LB: loop body
LE: loop exit
PB: predicated region body
PF: predicated region fallthrough
CT: control target
= control target key end

     0   :  { %9 = vsyncpa [#allocation3], 0  ;;  %s919_s0 = inlined_call_operand.hbm [shape: f32[128,128], index: 0, kind: input, shape index: {}]   ;;  %s920_s1 = inlined_call_operand.hbm [shape: bf16[128,128], index: 1, kind: input, shape index: {}]   ;;  %s921_s2 = inlined_call_operand.hbm [shape: bf16[128,128], index: 2, kind: input, shape index: {}]   ;;  %s922_s3 = inlined_call_operand.vmem [shape: f32[2,128], index: 3, kind: input, shape index: {}]   ;;  %s923_s4 = inlined_call_operand.hbm [shape: f32[128,128], index: 4, kind: output, shape index: {}]  }
   0x1   :  { %10 = vsyncpa [#allocation6], 0 }
   0x2   :  { %11 = vsyncpa [#allocation4], 0  ;;  %s738_s15 = smov [#allocation5]   ;;  %s644_s19 = scalar_lea.hbm %s920_s1, 1024 }
   0x3   :  { %s29_s16 = sshll.u32 %s738_s15, 4  ;;  %p645_p0 = scmp.ne.s32.totalorder %s920_s1, %s644_s19  ;;  %s30_s16 = int_to_ptr.vmem [resolvable:$true] %s29_s16 }
   0x4   :  { %p648_p1 = scmp.lt.u32.totalorder %s644_s19, %s920_s1 }
   0x6   :  { %p650_p2 = pnand %p648_p1, %p645_p0 }
   0x8   :  { %653 = shalt.err (!%p650_p2)
}
   0x9   :  { %s654_s24 = scalar_lea.vmem %s30_s16, 1024  ;;  %p659_p4 = scmp.lt.s32.totalorder %s30_s16, %s30_s16 }
   0xa   :  { %p655_p3 = scmp.ne.s32.totalorder %s30_s16, %s654_s24  ;;  %p660_p5 = scmp.lt.s32.totalorder %s654_s24, %s654_s24 }
   0xc   :  { %p661_p6 = por %p660_p5, %p659_p4 }
   0xe   :  { %p662_p7 = pnand %p661_p6, %p655_p3 }
  0x10   :  { %665 = shalt.err (!%p662_p7)
}
  0x11   :  { %s739_s25 = smov 64   ;;  %s740_s26 = smov 4  }
  0x12   :  { %35 = dma.hbm_to_vmem [thread:$0]  %s920_s1, 1024, %s30_s16, [#allocation6], %s739_s25, %s739_s25, %s740_s26  }
  0x13   :  { %s741_s29 = smov [#allocation2]   ;;  %s666_s7 = scalar_lea.hbm %s919_s0, 2048 }
  0x14   :  { %s17_s30 = sshll.u32 %s741_s29, 4  ;;  %p667_p8 = scmp.ne.s32.totalorder %s919_s0, %s666_s7  ;;  %s18_s30 = int_to_ptr.vmem [resolvable:$true] %s17_s30 }
  0x15   :  { %p670_p9 = scmp.lt.u32.totalorder %s666_s7, %s919_s0 }
  0x17   :  { %p672_p10 = pnand %p670_p9, %p667_p8 }
  0x19   :  { %675 = shalt.err (!%p672_p10)
}
  0x1a   :  { %s676_s12 = scalar_lea.vmem %s18_s30, 2048  ;;  %p681_p12 = scmp.lt.s32.totalorder %s18_s30, %s18_s30 }
  0x1b   :  { %p677_p11 = scmp.ne.s32.totalorder %s18_s30, %s676_s12  ;;  %p682_p13 = scmp.lt.s32.totalorder %s676_s12, %s676_s12 }
  0x1d   :  { %p683_p0 = por %p682_p13, %p681_p12 }
  0x1f   :  { %p684_p1 = pnand %p683_p0, %p677_p11 }
  0x21   :  { %687 = shalt.err (!%p684_p1)
}
  0x22   :  { %s742_s1 = smov 128   ;;  %s743_s13 = smov 8  }
  0x23   :  { %23 = dma.hbm_to_vmem [thread:$0]  %s919_s0, 2048, %s18_s30, [#allocation3], %s742_s1, %s742_s1, %s743_s13  }
  0x24   :  { %s744_s16 = smov [#allocation7]   ;;  %s688_s20 = scalar_lea.hbm %s921_s2, 1024 }
  0x25   :  { %s41_s17 = sshll.u32 %s744_s16, 4  ;;  %p689_p2 = scmp.ne.s32.totalorder %s921_s2, %s688_s20  ;;  %s42_s17 = int_to_ptr.vmem [resolvable:$true] %s41_s17 }
  0x26   :  { %p692_p3 = scmp.lt.u32.totalorder %s688_s20, %s921_s2 }
  0x28   :  { %p694_p4 = pnand %p692_p3, %p689_p2 }
  0x2a   :  { %697 = shalt.err (!%p694_p4)
}
  0x2b   :  { %s698_s27 = scalar_lea.vmem %s42_s17, 1024  ;;  %p703_p6 = scmp.lt.s32.totalorder %s42_s17, %s42_s17 }
  0x2c   :  { %p699_p5 = scmp.ne.s32.totalorder %s42_s17, %s698_s27  ;;  %p704_p7 = scmp.lt.s32.totalorder %s698_s27, %s698_s27 }
  0x2e   :  { %p705_p8 = por %p704_p7, %p703_p6 }
  0x30   :  { %p706_p9 = pnand %p705_p8, %p699_p5 }
  0x32   :  { %709 = shalt.err (!%p706_p9)
}
  0x33   :  { %47 = dma.hbm_to_vmem [thread:$0]  %s921_s2, 1024, %s42_s17, [#allocation6], %s739_s25, %s739_s25, %s740_s26  }
  0x34   :  { %732 = dma.done.wait [#allocation3], 2048  }
  0x35   :  { %733 = vsyncadd [#allocation3], 4294965248 }
  0x36   :  { %734 = dma.done.wait [#allocation6], 2048  }
  0x37   :  { %735 = vsyncadd [#allocation6], 4294965248  ;;  %v628_v0 = vld [vmem:[#allocation5] sm:$0xff]   ;;  %v629_v1 = vld [vmem:[#allocation5 + $0x8] sm:$0xff]  }
  0x38   :  { %556 = vmatprep.subr.bf16.mxu0 %v628_v0  ;;  %v630_v2 = vld [vmem:[#allocation5 + $0x10] sm:$0xff]   ;;  %v631_v3 = vld [vmem:[#allocation5 + $0x18] sm:$0xff]   ;;  %v816_v4 = vld [vmem:[#allocation2] sm:$0xff] }
  0x39   :  { %557 = vmatpush3.bf16.msra.mxu0 %v628_v0  ;;  %v818_v5 = vld [vmem:[#allocation2 + $0x8] sm:$0xff]  ;;  %v632_v7 = vld [vmem:[#allocation5 + $0x20] sm:$0xff]   ;;  %v638_v11 = vld [vmem:[#allocation7 + $0x10] sm:$0xff]  }
  0x3a   :  { %558 = vmatprep.subr.bf16.mxu0 %v629_v1  ;;  %v78_v6 = vpack.c.bf16 %v818_v5, %v816_v4  ;;  %v636_v8 = vld [vmem:[#allocation7] sm:$0xff]   ;;  %v637_v9 = vld [vmem:[#allocation7 + $0x8] sm:$0xff]   ;;  %v634_v12 = vld [vmem:[#allocation5 + $0x30] sm:$0xff]  }
  0x3b   :  { %v633_v10 = vld [vmem:[#allocation5 + $0x28] sm:$0xff]   ;;  %588 = vmatprep.subr.bf16.mxu1 %v636_v8  ;;  %v639_v13 = vld [vmem:[#allocation7 + $0x18] sm:$0xff]   ;;  %v640_v15 = vld [vmem:[#allocation7 + $0x20] sm:$0xff]  }
  0x3c   :  { %572 = vmatprep.mubr.bf16.mxu0 %v78_v6  ;;  %589 = vmatpush3.bf16.msra.mxu1 %v636_v8  ;;  %v635_v14 = vld [vmem:[#allocation5 + $0x38] sm:$0xff]   ;;  %v822_v16 = vld [vmem:[#allocation2 + $0x10] sm:$0xff]  ;;  %v826_v18 = vld [vmem:[#allocation2 + $0x20] sm:$0xff] }
  0x3d   :  { %559 = vmatpush3.bf16.msra.mxu0 %v629_v1  ;;  %590 = vmatprep.subr.bf16.mxu1 %v637_v9  ;;  %v824_v17 = vld [vmem:[#allocation2 + $0x18] sm:$0xff]  ;;  %v828_v19 = vld [vmem:[#allocation2 + $0x28] sm:$0xff]  ;;  %v834_v23 = vld [vmem:[#allocation2 + $0x30] sm:$0xff] }
  0x3e   :  { %560 = vmatprep.subr.bf16.mxu0 %v630_v2  ;;  %v79_v20 = vpack.c.bf16 %v824_v17, %v822_v16  ;;  %v641_v21 = vld [vmem:[#allocation7 + $0x28] sm:$0xff]   ;;  %v80_v22 = vpack.c.bf16 %v828_v19, %v826_v18  ;;  %v836_v24 = vld [vmem:[#allocation2 + $0x38] sm:$0xff]  ;;  %v838_v25 = vld [vmem:[#allocation2 + $0x40] sm:$0xff] }
  0x3f   :  { %v840_v26 = vld [vmem:[#allocation2 + $0x48] sm:$0xff]  ;;  %v81_v27 = vpack.c.bf16 %v836_v24, %v834_v23  ;;  %v846_v29 = vld [vmem:[#allocation2 + $0x50] sm:$0xff]  ;;  %v848_v30 = vld [vmem:[#allocation2 + $0x58] sm:$0xff] }
  0x40   :  { %591 = vmatpush3.bf16.msra.mxu1 %v637_v9  ;;  %v82_v28 = vpack.c.bf16 %v840_v26, %v838_v25  ;;  %v850_v31 = vld [vmem:[#allocation2 + $0x60] sm:$0xff]  ;;  %v852_v32 = vld [vmem:[#allocation2 + $0x68] sm:$0xff]  ;;  %v83_v33 = vpack.c.bf16 %v848_v30, %v846_v29  ;;  %v858_v35 = vld [vmem:[#allocation2 + $0x70] sm:$0xff] }
  0x41   :  { %561 = vmatpush3.bf16.msra.mxu0 %v630_v2  ;;  %592 = vmatprep.subr.bf16.mxu1 %v638_v11  ;;  %v84_v34 = vpack.c.bf16 %v852_v32, %v850_v31  ;;  %v860_v36 = vld [vmem:[#allocation2 + $0x78] sm:$0xff]  ;;  %v642_v38 = vld [vmem:[#allocation7 + $0x30] sm:$0xff]   ;;  %v506_v40 = vld [vmem:[%s922_s3] ss:$0 sm:$0xff] }
  0x42   :  { %562 = vmatprep.subr.bf16.mxu0 %v631_v3  ;;  %v85_v37 = vpack.c.bf16 %v860_v36, %v858_v35  ;;  %v643_v39 = vld [vmem:[#allocation7 + $0x38] sm:$0xff]  }
  0x44   :  { %593 = vmatpush3.bf16.msra.mxu1 %v638_v11 }
  0x45   :  { %563 = vmatpush3.bf16.msra.mxu0 %v631_v3  ;;  %594 = vmatprep.subr.bf16.mxu1 %v639_v13 }
  0x46   :  { %564 = vmatprep.subr.bf16.mxu0 %v632_v7 }
  0x48   :  { %595 = vmatpush3.bf16.msra.mxu1 %v639_v13 }
  0x49   :  { %565 = vmatpush3.bf16.msra.mxu0 %v632_v7  ;;  %596 = vmatprep.subr.bf16.mxu1 %v640_v15 }
  0x4a   :  { %566 = vmatprep.subr.bf16.mxu0 %v633_v10 }
  0x4c   :  { %597 = vmatpush3.bf16.msra.mxu1 %v640_v15 }
  0x4d   :  { %567 = vmatpush3.bf16.msra.mxu0 %v633_v10  ;;  %598 = vmatprep.subr.bf16.mxu1 %v641_v21 }
  0x4e   :  { %568 = vmatprep.subr.bf16.mxu0 %v634_v12 }
  0x50   :  { %599 = vmatpush3.bf16.msra.mxu1 %v641_v21 }
  0x51   :  { %569 = vmatpush3.bf16.msra.mxu0 %v634_v12  ;;  %600 = vmatprep.subr.bf16.mxu1 %v642_v38 }
  0x52   :  { %570 = vmatprep.subr.bf16.mxu0 %v635_v14 }
  0x54   :  { %601 = vmatpush3.bf16.msra.mxu1 %v642_v38 }
  0x55   :  { %571 = vmatpush3.bf16.msra.mxu0 %v635_v14  ;;  %602 = vmatprep.subr.bf16.mxu1 %v643_v39 }
  0x58   :  { %573 = vmatmul.mubr.bf16.vlgmr.msra.gmra.mrb[0].mxu0 %v79_v20  ;;  %603 = vmatpush3.bf16.msra.mxu1 %v643_v39 }
  0x59   :  { %576 = vmatprep.mubr.bf16.mxu0 %v80_v22 }
  0x60   :  { %577 = vmatmul.mubr.bf16.gmra.mrb[4].mxu0 %v81_v27 }
  0x61   :  { %580 = vmatprep.mubr.bf16.mxu0 %v82_v28 }
  0x68   :  { %581 = vmatmul.mubr.bf16.gmra.mrb[8].mxu0 %v83_v33 }
  0x69   :  { %584 = vmatprep.mubr.bf16.mxu0 %v84_v34 }
  0x70   :  { %585 = vmatmul.mubr.bf16.gmra.mrb[12].mxu0 %v85_v37 }
 0x12b   :  { %v574_v41 = vpop.f32.mrb[0].mxu0 }
 0x12c   :  { %v197_v42 = vadd.f32 %v574_v41, %v506_v40  ;;  %v188_v43 = vpop.f32.mrb[1].mxu0 }
 0x12d   :  { %v189_v44 = vadd.f32 %v506_v40, %v188_v43  ;;  %v575_v45 = vpop.f32.mrb[2].mxu0 }
 0x12e   :  { %v200_v46 = vadd.f32 %v575_v45, %v506_v40  ;;  %v191_v47 = vpop.f32.mrb[3].mxu0  ;;  %v253_v49 = vmax.f32 %v197_v42, 0.0 }
 0x12f   :  { %v192_v48 = vadd.f32 %v506_v40, %v191_v47  ;;  %v251_v51 = vmax.f32 %v189_v44, 0.0 }
 0x130   :  { %v254_v50 = vmax.f32 %v200_v46, 0.0 }
 0x131   :  { %v252_v52 = vmax.f32 %v192_v48, 0.0 }
 0x132   :  { %v268_v53 = vpack.c.bf16 %v254_v50, %v253_v49  ;;  %v870_v50 = vld [vmem:[%s922_s3 + $0x1] ss:$0 sm:$0xff]  ;;  %s745_s3 = smov [#allocation8]  }
 0x133   :  { %v578_v54 = vpop.f32.mrb[4].mxu0  ;;  %v267_v55 = vpack.c.bf16 %v252_v52, %v251_v51  ;;  %s493_s30 = sshll.u32 %s745_s3, 4  ;;  %s494_s30 = int_to_ptr.vmem [resolvable:$true] %s493_s30 }
 0x134   :  { %v213_v56 = vadd.f32 %v578_v54, %v506_v40  ;;  %v204_v57 = vpop.f32.mrb[5].mxu0  ;;  %s710_s5 = scalar_lea.vmem %s494_s30, 2048  ;;  %p715_p11 = scmp.lt.s32.totalorder %s494_s30, %s494_s30 }
 0x135   :  { %v205_v58 = vadd.f32 %v506_v40, %v204_v57  ;;  %v579_v59 = vpop.f32.mrb[6].mxu0  ;;  %604 = vmatprep.mubr.bf16.mxu1 %v267_v55  ;;  %p711_p10 = scmp.ne.s32.totalorder %s494_s30, %s710_s5  ;;  %p716_p12 = scmp.lt.s32.totalorder %s710_s5, %s710_s5 }
 0x136   :  { %v216_v60 = vadd.f32 %v579_v59, %v506_v40  ;;  %v207_v61 = vpop.f32.mrb[7].mxu0  ;;  %605 = vmatmul.mubr.bf16.vlgmr.msra.gmra.mrb[0].mxu1 %v268_v53  ;;  %v257_v63 = vmax.f32 %v213_v56, 0.0 }
 0x137   :  { %v208_v62 = vadd.f32 %v506_v40, %v207_v61  ;;  %v255_v1 = vmax.f32 %v205_v58, 0.0  ;;  %p717_p13 = por %p716_p12, %p715_p11 }
 0x138   :  { %v258_v0 = vmax.f32 %v216_v60, 0.0 }
 0x139   :  { %v256_v2 = vmax.f32 %v208_v62, 0.0  ;;  %p718_p0 = pnand %p717_p13, %p711_p10 }
 0x13a   :  { %v270_v3 = vpack.c.bf16 %v258_v0, %v257_v63 }
 0x13b   :  { %v269_v6 = vpack.c.bf16 %v256_v2, %v255_v1  ;;  %v582_v7 = vpop.f32.mrb[8].mxu0 }
 0x13c   :  { %v229_v8 = vadd.f32 %v582_v7, %v506_v40  ;;  %v220_v9 = vpop.f32.mrb[9].mxu0 }
 0x13d   :  { %v221_v10 = vadd.f32 %v506_v40, %v220_v9  ;;  %v583_v11 = vpop.f32.mrb[10].mxu0  ;;  %608 = vmatprep.mubr.bf16.mxu1 %v269_v6 }
 0x13e   :  { %v232_v12 = vadd.f32 %v583_v11, %v506_v40  ;;  %v223_v13 = vpop.f32.mrb[11].mxu0  ;;  %609 = vmatmul.mubr.bf16.gmra.mrb[4].mxu1 %v270_v3  ;;  %v261_v15 = vmax.f32 %v229_v8, 0.0 }
 0x13f   :  { %v224_v14 = vadd.f32 %v506_v40, %v223_v13  ;;  %v259_v21 = vmax.f32 %v221_v10, 0.0 }
 0x140   :  { %v262_v20 = vmax.f32 %v232_v12, 0.0 }
 0x141   :  { %v260_v22 = vmax.f32 %v224_v14, 0.0 }
 0x142   :  { %v272_v27 = vpack.c.bf16 %v262_v20, %v261_v15 }
 0x143   :  { %v271_v28 = vpack.c.bf16 %v260_v22, %v259_v21  ;;  %v586_v33 = vpop.f32.mrb[12].mxu0 }
 0x144   :  { %v245_v34 = vadd.f32 %v586_v33, %v506_v40  ;;  %v236_v37 = vpop.f32.mrb[13].mxu0 }
 0x145   :  { %v237_v38 = vadd.f32 %v506_v40, %v236_v37  ;;  %v587_v39 = vpop.f32.mrb[14].mxu0  ;;  %612 = vmatprep.mubr.bf16.mxu1 %v271_v28 }
 0x146   :  { %v248_v41 = vadd.f32 %v587_v39, %v506_v40  ;;  %v239_v42 = vpop.f32.mrb[15].mxu0  ;;  %613 = vmatmul.mubr.bf16.gmra.mrb[8].mxu1 %v272_v27  ;;  %v265_v44 = vmax.f32 %v245_v34, 0.0 }
 0x147   :  { %v240_v43 = vadd.f32 %v506_v40, %v239_v42  ;;  %v263_v46 = vmax.f32 %v237_v38, 0.0 }
 0x148   :  { %v266_v45 = vmax.f32 %v248_v41, 0.0 }
 0x149   :  { %v264_v47 = vmax.f32 %v240_v43, 0.0 }
 0x14a   :  { %v274_v48 = vpack.c.bf16 %v266_v45, %v265_v44 }
 0x14b   :  { %v273_v49 = vpack.c.bf16 %v264_v47, %v263_v46 }
 0x14d   :  { %616 = vmatprep.mubr.bf16.mxu1 %v273_v49 }
 0x14e   :  { %617 = vmatmul.mubr.bf16.gmra.mrb[12].mxu1 %v274_v48 }
 0x209   :  { %v606_v51 = vpop.f32.mrb[0].mxu1 }
 0x20a   :  { %v386_v52 = vadd.f32 %v606_v51, %v870_v50  ;;  %v377_v53 = vpop.f32.mrb[1].mxu1 }
 0x20b   :  { %v378_v54 = vadd.f32 %v870_v50, %v377_v53  ;;  %v607_v40 = vpop.f32.mrb[2].mxu1 }
 0x20c   :  { %v442_v55 = vadd.f32 %v386_v52, %v822_v16  ;;  %v389_v56 = vadd.f32 %v607_v40, %v870_v50  ;;  %v380_v57 = vpop.f32.mrb[3].mxu1 }
 0x20d   :  { %v440_v58 = vadd.f32 %v378_v54, %v816_v4  ;;  %v381_v59 = vadd.f32 %v870_v50, %v380_v57 }
 0x20e   :  { %v458_v60 = vmax.f32 %v442_v55, 0.0  ;;  %v443_v61 = vadd.f32 %v389_v56, %v824_v17 }
 0x20f   :  { %v456_v62 = vmax.f32 %v440_v58, 0.0  ;;  %v441_v63 = vadd.f32 %v381_v59, %v818_v5 }
 0x210   :  { %474 = vst [vmem:[#allocation8 + $0x10] sm:$0xff] %v458_v60  ;;  %v459_v0 = vmax.f32 %v443_v61, 0.0 }
 0x211   :  { %472 = vst [vmem:[#allocation8] sm:$0xff] %v456_v62  ;;  %v457_v1 = vmax.f32 %v441_v63, 0.0  ;;  %v610_v2 = vpop.f32.mrb[4].mxu1 }
 0x212   :  { %475 = vst [vmem:[#allocation8 + $0x18] sm:$0xff] %v459_v0  ;;  %v402_v16 = vadd.f32 %v610_v2, %v870_v50  ;;  %v393_v3 = vpop.f32.mrb[5].mxu1 }
 0x213   :  { %473 = vst [vmem:[#allocation8 + $0x8] sm:$0xff] %v457_v1  ;;  %v394_v4 = vadd.f32 %v870_v50, %v393_v3  ;;  %v611_v6 = vpop.f32.mrb[6].mxu1 }
 0x214   :  { %v446_v7 = vadd.f32 %v402_v16, %v834_v23  ;;  %v405_v17 = vadd.f32 %v611_v6, %v870_v50  ;;  %v396_v8 = vpop.f32.mrb[7].mxu1 }
 0x215   :  { %v444_v5 = vadd.f32 %v394_v4, %v826_v18  ;;  %v397_v9 = vadd.f32 %v870_v50, %v396_v8 }
 0x216   :  { %v462_v10 = vmax.f32 %v446_v7, 0.0  ;;  %v447_v11 = vadd.f32 %v405_v17, %v836_v24 }
 0x217   :  { %v460_v12 = vmax.f32 %v444_v5, 0.0  ;;  %v445_v13 = vadd.f32 %v397_v9, %v828_v19 }
 0x218   :  { %478 = vst [vmem:[#allocation8 + $0x30] sm:$0xff] %v462_v10  ;;  %v463_v14 = vmax.f32 %v447_v11, 0.0 }
 0x219   :  { %476 = vst [vmem:[#allocation8 + $0x20] sm:$0xff] %v460_v12  ;;  %v461_v15 = vmax.f32 %v445_v13, 0.0  ;;  %v614_v20 = vpop.f32.mrb[8].mxu1 }
 0x21a   :  { %479 = vst [vmem:[#allocation8 + $0x38] sm:$0xff] %v463_v14  ;;  %v418_v23 = vadd.f32 %v614_v20, %v870_v50  ;;  %v409_v21 = vpop.f32.mrb[9].mxu1 }
 0x21b   :  { %477 = vst [vmem:[#allocation8 + $0x28] sm:$0xff] %v461_v15  ;;  %v410_v18 = vadd.f32 %v870_v50, %v409_v21  ;;  %v615_v22 = vpop.f32.mrb[10].mxu1 }
 0x21c   :  { %v450_v27 = vadd.f32 %v418_v23, %v846_v29  ;;  %v421_v24 = vadd.f32 %v615_v22, %v870_v50  ;;  %v412_v28 = vpop.f32.mrb[11].mxu1 }
 0x21d   :  { %v448_v19 = vadd.f32 %v410_v18, %v838_v25  ;;  %v413_v33 = vadd.f32 %v870_v50, %v412_v28 }
 0x21e   :  { %v466_v34 = vmax.f32 %v450_v27, 0.0  ;;  %v451_v37 = vadd.f32 %v421_v24, %v848_v30 }
 0x21f   :  { %v464_v38 = vmax.f32 %v448_v19, 0.0  ;;  %v449_v39 = vadd.f32 %v413_v33, %v840_v26 }
 0x220   :  { %482 = vst [vmem:[#allocation8 + $0x50] sm:$0xff] %v466_v34  ;;  %v467_v41 = vmax.f32 %v451_v37, 0.0 }
 0x221   :  { %480 = vst [vmem:[#allocation8 + $0x40] sm:$0xff] %v464_v38  ;;  %v465_v42 = vmax.f32 %v449_v39, 0.0  ;;  %v618_v43 = vpop.f32.mrb[12].mxu1 }
 0x222   :  { %483 = vst [vmem:[#allocation8 + $0x58] sm:$0xff] %v467_v41  ;;  %v434_v29 = vadd.f32 %v618_v43, %v870_v50  ;;  %v425_v44 = vpop.f32.mrb[13].mxu1 }
 0x223   :  { %481 = vst [vmem:[#allocation8 + $0x48] sm:$0xff] %v465_v42  ;;  %v426_v25 = vadd.f32 %v870_v50, %v425_v44  ;;  %v619_v45 = vpop.f32.mrb[14].mxu1 }
 0x224   :  { %v454_v46 = vadd.f32 %v434_v29, %v858_v35  ;;  %v437_v30 = vadd.f32 %v619_v45, %v870_v50  ;;  %v428_v47 = vpop.f32.mrb[15].mxu1 }
 0x225   :  { %v452_v26 = vadd.f32 %v426_v25, %v850_v31  ;;  %v429_v48 = vadd.f32 %v870_v50, %v428_v47 }
 0x226   :  { %v470_v49 = vmax.f32 %v454_v46, 0.0  ;;  %v455_v51 = vadd.f32 %v437_v30, %v860_v36 }
 0x227   :  { %v468_v52 = vmax.f32 %v452_v26, 0.0  ;;  %v453_v53 = vadd.f32 %v429_v48, %v852_v32 }
 0x228   :  { %486 = vst [vmem:[#allocation8 + $0x70] sm:$0xff] %v470_v49  ;;  %v471_v54 = vmax.f32 %v455_v51, 0.0 }
 0x229   :  { %484 = vst [vmem:[#allocation8 + $0x60] sm:$0xff] %v468_v52  ;;  %v469_v40 = vmax.f32 %v453_v53, 0.0 }
 0x22a   :  { %487 = vst [vmem:[#allocation8 + $0x78] sm:$0xff] %v471_v54 }
 0x22b   :  { %485 = vst [vmem:[#allocation8 + $0x68] sm:$0xff] %v469_v40 }
 0x22c   :  { %721 = shalt.err (!%p718_p0)
}
 0x22d   :  { %s722_s8 = scalar_lea.hbm %s923_s4, 2048 }
 0x22e   :  { %p723_p1 = scmp.ne.s32.totalorder %s923_s4, %s722_s8  ;;  %p726_p2 = scmp.lt.u32.totalorder %s722_s8, %s923_s4 }
 0x230   :  { %p728_p3 = pnand %p726_p2, %p723_p1 }
 0x232   :  { %731 = shalt.err (!%p728_p3)
}
 0x233   :  { %499 = dma.vmem_to_hbm [thread:$0]  %s494_s30, 2048, %s923_s4, [#allocation4], %s742_s1, %s742_s1, %s743_s13  }
 0x234   :  { %736 = dma.done.wait [#allocation4], 2048  }
 0x235   :  { %737 = vsyncadd [#allocation4], 4294965248 }
 0x236   :  { %503 = vsyncpa [#allocation3], 1 }
 0x237   :  { %504 = vsyncpa [#allocation6], 1 }
 0x238   :  { %505 = vsyncpa [#allocation4], 1 }

</bundles_post_ra>
